<compile_context>
chip_gen: v6e
topology: v6e:2x2x1
jax: 0.10.0
libtpu: 0.0.40
codegen_flags: <defaults>
</compile_context>

<pallas_src>
import functools

import jax
import jax.numpy as jnp
from jax.experimental import pallas as pl
from jax.experimental.pallas import tpu as pltpu

D_MODEL = 20
DROP_OUT = 0.3
MAX_SEQ_LEN = 5000


def make_positional_encoding(max_seq_len: int, d_model: int) -> jnp.ndarray:
    """Replicates the torch buffer `pe` (before unsqueeze/transpose): (max_seq_len, d_model)."""
    position = jnp.arange(max_seq_len, dtype=jnp.float32)[:, None]            # (L, 1)
    div_term = jnp.exp(
        jnp.arange(0, d_model, 2, dtype=jnp.float32) * (-jnp.log(10000.0) / d_model)
    )                                                                          # (d_model//2,)
    ang = position * div_term                                                  # (L, d_model//2)
    # interleave: even columns = sin, odd columns = cos
    pe = jnp.stack([jnp.sin(ang), jnp.cos(ang)], axis=-1).reshape(max_seq_len, d_model)
    return pe


def _pe_add_dropout_kernel(x_ref, pe_ref, bits_ref, o_ref, *, inv_keep, threshold):
    # x_ref: (bm, N) tile, pe_ref: (1, N) row (broadcast over sublanes), bits_ref: (bm, N) u32
    y = x_ref[...] + pe_ref[...]
    keep = bits_ref[...] < jnp.uint32(threshold)
    o_ref[...] = jnp.where(keep, y * jnp.float32(inv_keep), jnp.float32(0.0)).astype(o_ref.dtype)


def _pe_add_kernel(x_ref, pe_ref, o_ref):
    o_ref[...] = (x_ref[...] + pe_ref[...]).astype(o_ref.dtype)


def _pick_row_tile(n_rows: int, bytes_per_row: int) -> int:
    """Multiple-of-8 divisor of n_rows under a ~2 MiB tile budget; prefer >=2 grid
    steps (v7x has 2 TensorCores). Falls back to the full extent (always a legal
    block shape) when n_rows is not a multiple of 8."""
    if n_rows % 8 != 0:
        return n_rows
    budget_rows = (2 * 1024 * 1024) // max(bytes_per_row, 1)
    budget_rows -= budget_rows % 8
    bm = max(8, min(n_rows, budget_rows))
    while n_rows % bm != 0:
        bm -= 8
    if bm == n_rows and n_rows >= 16 and (n_rows // 2) % 8 == 0:
        bm = n_rows // 2          # keep two parallel steps for megacore sharding
    return bm


def positional_encoding_forward(x, pe_full, *, drop_out=DROP_OUT, training=True, rng_key=None):
    """x: (B, S, D) with S == B (as the original module's broadcast requires)."""
    B, S, D = x.shape
    if S != B:
        raise ValueError("PositionalEncoding.forward requires x.shape[1] == x.shape[0]")
    N = S * D

    x2 = x.reshape(B, N)                                   # lane-dense 2-D view
    pe_row = pe_full[:B, :].reshape(1, N).astype(x.dtype)  # pe[:x.size(0)] along seq axis

    bm = _pick_row_tile(B, N * x2.dtype.itemsize)
    grid = (B // bm,)
    row_spec = pl.BlockSpec((bm, N), lambda i: (i, 0))
    pe_spec = pl.BlockSpec((1, N), lambda i: (0, 0))
    out_shape = jax.ShapeDtypeStruct((B, N), x.dtype)
    cparams = pltpu.CompilerParams(dimension_semantics=("parallel",))

    keep_prob = 1.0 - float(drop_out)
    use_dropout = training and float(drop_out) > 0.0

    if use_dropout:
        if rng_key is None:
            rng_key = jax.random.PRNGKey(0)
        bits = jax.random.bits(rng_key, (B, N), dtype=jnp.uint32)
        threshold = min(int(round(keep_prob * (2.0 ** 32))), 2 ** 32 - 1)
        kernel = functools.partial(
            _pe_add_dropout_kernel, inv_keep=1.0 / keep_prob, threshold=threshold
        )
        y2 = pl.pallas_call(
            kernel,
            out_shape=out_shape,
            grid=grid,
            in_specs=[row_spec, pe_spec, row_spec],
            out_specs=row_spec,
            compiler_params=cparams,
        )(x2, pe_row, bits)
    else:
        y2 = pl.pallas_call(
            _pe_add_kernel,
            out_shape=out_shape,
            grid=grid,
            in_specs=[row_spec, pe_spec],
            out_specs=row_spec,
            compiler_params=cparams,
        )(x2, pe_row)

    return y2.reshape(B, S, D)


if __name__ == "__main__":
    key = jax.random.PRNGKey(0)
    k_x, k_drop = jax.random.split(key)

    B = S = 32                     # S multiple of 32 -> S*D = 640 is lane-dense (5*128)
    D = D_MODEL                    # 20
    x = jax.random.normal(k_x, (B, S, D), dtype=jnp.float32)
    pe_full = make_positional_encoding(MAX_SEQ_LEN, D)

    # Training-mode forward (stochastic dropout, deterministic via fixed key).
    out_train = positional_encoding_forward(
        x, pe_full, drop_out=DROP_OUT, training=True, rng_key=k_drop
    )
    out_train = jax.block_until_ready(out_train)

    # Eval-mode forward (dropout = identity) — check against pure-JAX reference.
    out_eval = positional_encoding_forward(x, pe_full, drop_out=DROP_OUT, training=False)
    out_eval = jax.block_until_ready(out_eval)

    ref = x + pe_full[:B, :][None, :, :]
    assert out_eval.shape == x.shape and out_eval.dtype == x.dtype
    assert jnp.allclose(out_eval, ref, atol=1e-5), "eval-mode mismatch"

    keep_prob = 1.0 - DROP_OUT
    ok = (out_train == 0) | jnp.isclose(out_train, ref / keep_prob, atol=1e-5)
    assert bool(jnp.all(ok)), "train-mode values must be 0 or (x+pe)/keep_prob"
    assert out_train.shape == x.shape and out_train.dtype == x.dtype

    print("KERNEL_OK")
</pallas_src>

<mosaic_0001>
module attributes {stable_mosaic.version = 11 : i64} {
  func.func @_pe_add_dropout_kernel(%arg0: i32, %arg1: memref<16x640xf32, #tpu.memory_space<vmem>>, %arg2: memref<1x640xf32, #tpu.memory_space<vmem>>, %arg3: memref<16x640xi32, #tpu.memory_space<vmem>>, %arg4: memref<16x640xf32, #tpu.memory_space<vmem>>) attributes {dimension_semantics = [#tpu.dimension_semantics<parallel>], iteration_bounds = array<i64: 2>, scalar_prefetch = 0 : i64, scratch_operands = 0 : i64, tpu.core_type = #tpu.core_type<tc>, window_params = [{transform_indices = @transform_0, window_bounds = array<i64: 16, 640>}, {pipeline_mode = #tpu.pipeline_mode<synchronous>, transform_indices = @transform_1, window_bounds = array<i64: 1, 640>}, {transform_indices = @transform_2, window_bounds = array<i64: 16, 640>}, {transform_indices = @transform_3, window_bounds = array<i64: 16, 640>}]} {
    %c0 = arith.constant 0 : index
    %c0_0 = arith.constant 0 : index
    %0 = vector.load %arg1[%c0, %c0_0] : memref<16x640xf32, #tpu.memory_space<vmem>>, vector<16x640xf32>
    %c0_1 = arith.constant 0 : index
    %c0_2 = arith.constant 0 : index
    %1 = vector.load %arg2[%c0_1, %c0_2] : memref<1x640xf32, #tpu.memory_space<vmem>>, vector<1x640xf32>
    %2 = vector.broadcast %1 : vector<1x640xf32> to vector<16x640xf32>
    %3 = arith.addf %0, %2 : vector<16x640xf32>
    %c0_3 = arith.constant 0 : index
    %c0_4 = arith.constant 0 : index
    %4 = vector.load %arg3[%c0_3, %c0_4] : memref<16x640xi32, #tpu.memory_space<vmem>>, vector<16x640xi32>
    %c-1288490189_i32 = arith.constant -1288490189 : i32
    %5 = vector.broadcast %c-1288490189_i32 : i32 to vector<16x640xi32>
    %6 = arith.cmpi ult, %4, %5 : vector<16x640xi32>
    %cst = arith.constant 1.42857146 : f32
    %7 = vector.broadcast %cst : f32 to vector<16x640xf32>
    %8 = arith.mulf %3, %7 : vector<16x640xf32>
    %cst_5 = arith.constant 0.000000e+00 : f32
    %9 = vector.broadcast %cst_5 : f32 to vector<16x640xf32>
    %10 = arith.select %6, %8, %9 : vector<16x640xi1>, vector<16x640xf32>
    %c0_6 = arith.constant 0 : index
    %c0_7 = arith.constant 0 : index
    %11 = vector.load %arg4[%c0_6, %c0_7] : memref<16x640xf32, #tpu.memory_space<vmem>>, vector<16x640xf32>
    tpu.vector_store %arg4[%c0_6, %c0_7], %10 {strides = array<i32>} : memref<16x640xf32, #tpu.memory_space<vmem>>, vector<16x640xf32>,
    return
  }
  func.func @transform_0(%arg0: i32) -> (i32, i32) {
    %c0_i32 = arith.constant 0 : i32
    %c0_i32_0 = arith.constant 0 : i32
    return %arg0, %c0_i32 : i32, i32
  }
  func.func @transform_1(%arg0: i32) -> (i32, i32) {
    %c0_i32 = arith.constant 0 : i32
    %c0_i32_0 = arith.constant 0 : i32
    %c0_i32_1 = arith.constant 0 : i32
    return %c0_i32, %c0_i32_0 : i32, i32
  }
  func.func @transform_2(%arg0: i32) -> (i32, i32) {
    %c0_i32 = arith.constant 0 : i32
    %c0_i32_0 = arith.constant 0 : i32
    return %arg0, %c0_i32 : i32, i32
  }
  func.func @transform_3(%arg0: i32) -> (i32, i32) {
    %c0_i32 = arith.constant 0 : i32
    %c0_i32_0 = arith.constant 0 : i32
    return %arg0, %c0_i32 : i32, i32
  }
}

</mosaic_0001>

<bundles_post_ra>
// kernel: tpu_custom_call.1
= control target key start
LH: loop header
LB: loop body
LE: loop exit
PB: predicated region body
PF: predicated region fallthrough
CT: control target
= control target key end

     0   :  { %8 = vsyncpa [#allocation3], 0  ;;  %s1025_s0 = inlined_call_operand.hbm [shape: f32[32,640], index: 0, kind: input, shape index: {}]   ;;  %s1026_s1 = inlined_call_operand.hbm [shape: f32[1,640], index: 1, kind: input, shape index: {}]   ;;  %s1027_s2 = inlined_call_operand.hbm [shape: u32[32,640], index: 2, kind: input, shape index: {}]   ;;  %s1028_s3 = inlined_call_operand.hbm [shape: f32[32,640], index: 3, kind: output, shape index: {}]  }
   0x1   :  { %10 = vsyncpa [#allocation3 + $0x1], 0 }
   0x2   :  { %11 = vsyncpa [#allocation6], 0 }
   0x3   :  { %12 = vsyncpa [#allocation4], 0 }
   0x4   :  { %14 = vsyncpa [#allocation4 + $0x1], 0  ;;  %s732_s12 = smov 0   ;;  %s734_s13 = smov 0  }
   0x5   :  { %s736_s14 = smov 0   ;;  %s738_s15 = smov 0  }
   0x6 LB: > { %s753_s16 = sadd.s32 1, %s702_s15   ;;  %s27_s17 = sadd.s32 1, %s698_s14  ;;  %s702_s15 = sphi %s738_s15, %s1049_s15   ;;  %s698_s14 = sphi %s736_s14, %s1048_s14   ;;  %s694_s13 = sphi %s734_s13, %s1047_s13   ;;  %s690_s12 = sphi %s732_s12, %s1046_s12  }
   0x7   : > { %s24_s18 = ssub.s32 %s702_s15, %s753_s16  ;;  %p34_p0 = scmp.ne.s32.totalorder %s698_s14, %s694_s13 }
   0x8   : > { %p25_p1 = scmp.eq.s32.totalorder %s24_s18, 0  ;;  %p35_p2 = scmp.eq.s32.totalorder %s702_s15, 0 }
   0x9   : > { %p508_p4 = scmp.lt.s32.totalorder %s702_s15, 2  ;;  %s148_s20 = sand.u32 1, %s702_s15  }
   0xa   : > { %s764_s19 = scalar_select %p25_p1, %s698_s14, %s27_s17  }
   0xb   : > { %p36_p5 = por %p35_p2, %p34_p0  ;;  %s150_s21 = sand.u32 1, %s698_s14  }
   0xc   : > { %s771_s22 = smul.u32 80, %s150_s21  ;;  %s788_s30 = scalar_lea.sflag [#allocation3], %s148_s20 }
   0xd   : > { %p773_p6 = pnand %p508_p4, %p36_p5  ;;  %s477_s24 = smul.u32 1280, %s702_s15 }
   0xe   : > { %s152_s28 = scalar_lea.vmem [#allocation2], %s771_s22  ;;  %s553_s7 = scalar_lea.hbm %s1025_s0, 2560 }
   0xf   : > { %s783_s27 = scalar_lea.hbm %s1025_s0, %s477_s24  ;;  %s160_s29 = sshll.u32 %s152_s28, 4  ;;  %s786_s29 = int_to_ptr.vmem [resolvable:$true] %s160_s29 }
  0x10   : > { %s548_s4 = scalar_lea.hbm %s783_s27, 1280  ;;  %p550_p8 = pneg %p773_p6 }
  0x11   : > { %p549_p7 = scmp.ne.s32.totalorder %s783_s27, %s548_s4  ;;  %p554_p11 = scmp.lt.s32.totalorder %s783_s27, %s1025_s0 }
  0x12   : > { %p555_p12 = scmp.lt.s32.totalorder %s553_s7, %s548_s4 }
  0x13   : > { %p551_p9 = pnand %p550_p8, %p549_p7 }
  0x14   : > { %p556_p13 = por %p555_p12, %p554_p11 }
  0x15   : > { %p552_p10 = pneg %p551_p9 }
  0x17   : > { %p557_p1 = pnand %p556_p13, %p552_p10 }
  0x19   : > { %560 = shalt.err (!%p557_p1)
}
  0x1a   : > { %s561_s10 = scalar_lea.vmem %s786_s29, 1280  ;;  %s704_s11 = smov [#allocation2]  }
  0x1b   : > { %p562_p2 = scmp.ne.s32.totalorder %s786_s29, %s561_s10  ;;  %s566_s17 = sshll.u32 %s704_s11, 4  ;;  %s567_s17 = int_to_ptr.vmem [resolvable:$false] %s566_s17 }
  0x1c   : > { %s568_s18 = scalar_lea.vmem %s567_s17, 2560  ;;  %p569_p7 = scmp.lt.s32.totalorder %s786_s29, %s567_s17 }
  0x1d   : > { %p564_p4 = pnand %p562_p2, %p550_p8  ;;  %p570_p9 = scmp.lt.s32.totalorder %s568_s18, %s561_s10 }
  0x1f   : > { %p565_p5 = pneg %p564_p4  ;;  %p571_p3 = por %p570_p9, %p569_p7 }
  0x21   : > { %p572_p11 = pnand %p571_p3, %p565_p5 }
  0x23   : > { %575 = shalt.err (!%p572_p11)
}
  0x24   : > { %s705_s20 = smov 640   ;;  %s706_s21 = smov 40  }
  0x25   : > { %499 = dma.hbm_to_vmem [thread:$0]  (!%p773_p6), %s783_s27, 1280, %s786_s29, %s788_s30, %s705_s20, %s705_s20, %s706_s21  }
  0x26   : > { %s819_s25 = sadd.s32 4294967295, %s702_s15   ;;  %s459_s26 = sadd.s32 4294967294, %s702_s15  }
  0x27   : > { %p40_p3 = scmp.ne.s32.totalorder %s694_s13, %s690_s12  ;;  %p1029_p10 = scmp.eq.s32.totalorder %s819_s25, 0 }
  0x28   : > { %p111_p12 = scmp.eq.s32.totalorder %s819_s25, 1  ;;  %p117_p13 = scmp.eq.s32.totalorder %s459_s26, 1 }
  0x29   : > { %p828_p1 = por %p1029_p10, %p40_p3  ;;  %p460_p2 = scmp.ge.s32.totalorder %s702_s15, 1 }
  0x2a   : > { %p836_p4 = por %p111_p12, %p34_p0  ;;  %p840_p5 = por %p117_p13, %p40_p3 }
  0x2b   : > { %s1034_s28 = scalar_select %p828_p1, 1, 0 }
  0x2c   : > { %s1035_s27 = scalar_select %p836_p4, 1, 0 }
  0x2d   : > { %s1036_s29 = scalar_select %p840_p5, 1, 0 }
  0x2e   : > { %p124_p7 = scmp.lt.s32.totalorder %s702_s15, 3  ;;  %s707_s5 = smov [#allocation5]  }
  0x2f   : > { %s137_s6 = sshll.u32 %s707_s5, 4  ;;  %s854_s9 = scalar_lea.hbm %s1027_s2, %s477_s24  ;;  %s861_s6 = int_to_ptr.vmem [resolvable:$true] %s137_s6 }
  0x30   : > { %p845_p9 = pnand %p460_p2, %p124_p7  ;;  %s174_s10 = scalar_lea.vmem [#allocation7], %s771_s22 }
  0x31   : > { %s182_s11 = sshll.u32 %s174_s10, 4  ;;  %s576_s18 = scalar_lea.hbm %s854_s9, 1280  ;;  %s859_s11 = int_to_ptr.vmem [resolvable:$true] %s182_s11 }
  0x32   : > { %s1037_s4 = scalar_select %p845_p9, 1, 0 }
  0x33   : > { %p492_p0 = pneg %p845_p9  ;;  %p577_p3 = scmp.ne.s32.totalorder %s854_s9, %s576_s18 }
  0x34   : > { %s581_s22 = scalar_lea.hbm %s1027_s2, 2560  ;;  %p582_p2 = scmp.lt.s32.totalorder %s854_s9, %s1027_s2 }
  0x35   : > { %p865_p11 = pnand %p492_p0, %p1029_p10  ;;  %p579_p12 = pnand %p577_p3, %p550_p8 }
  0x36   : > { %p583_p7 = scmp.lt.s32.totalorder %s581_s22, %s576_s18 }
  0x37   : > { %p580_p13 = pneg %p579_p12 }
  0x38   : > { %p584_p5 = por %p583_p7, %p582_p2 }
  0x3a   : > { %p585_p0 = pnand %p584_p5, %p580_p13 }
  0x3c   : > { %588 = shalt.err (!%p585_p0)
}
  0x3d   : > { %s589_s8 = scalar_lea.vmem %s859_s11, 1280  ;;  %s708_s10 = smov [#allocation7]  }
  0x3e   : > { %p590_p10 = scmp.ne.s32.totalorder %s859_s11, %s589_s8  ;;  %s594_s24 = sshll.u32 %s708_s10, 4  ;;  %s595_s24 = int_to_ptr.vmem [resolvable:$false] %s594_s24 }
  0x3f   : > { %s596_s26 = scalar_lea.vmem %s595_s24, 2560  ;;  %p597_p4 = scmp.lt.s32.totalorder %s859_s11, %s595_s24 }
  0x40   : > { %p592_p3 = pnand %p590_p10, %p550_p8  ;;  %p598_p1 = scmp.lt.s32.totalorder %s596_s26, %s589_s8 }
  0x42   : > { %p593_p12 = pneg %p592_p3  ;;  %p599_p9 = por %p598_p1, %p597_p4 }
  0x44   : > { %p600_p2 = pnand %p599_p9, %p593_p12 }
  0x46   : > { %603 = shalt.err (!%p600_p2)
}
  0x47   : > { %502 = dma.hbm_to_vmem [thread:$0]  (!%p773_p6), %s854_s9, 1280, %s859_s11, %s788_s30, %s705_s20, %s705_s20, %s706_s21  }
  0x48   : > { %p606_p8 = pneg %p865_p11  ;;  %s615_s18 = scalar_lea.vmem %s861_s6, 80 }
  0x49   : > { %p616_p10 = scmp.ne.s32.totalorder %s861_s6, %s615_s18  ;;  %s622_s22 = scalar_lea.vmem %s861_s6, 96 }
  0x4a   : > { %p623_p5 = scmp.lt.s32.totalorder %s861_s6, %s861_s6  ;;  %p624_p9 = scmp.lt.s32.totalorder %s622_s22, %s615_s18 }
  0x4b   : > { %p618_p1 = pnand %p616_p10, %p606_p8 }
  0x4c   : > { %p625_p13 = por %p624_p9, %p623_p5 }
  0x4d   : > { %p619_p4 = pneg %p618_p1 }
  0x4f   : > { %p626_p7 = pnand %p625_p13, %p619_p4 }
  0x51   : > { %629 = shalt.err (!%p626_p7)
}
  0x52   : > { %495 = dma.hbm_to_vmem [thread:$0]  (!%p865_p11), %s1026_s1, 80, %s861_s6, [#allocation6]  }
  0x53   : > { %p1039_p6 = scmp.ne.s32.totalorder %s1037_s4, 0 }
  0x54   : > { %s196_s30 = sand.u32 (!%p1039_p6), 1, %s819_s25   ;;  %s198_s20 = sand.u32 (!%p1039_p6), 1, %s694_s13  }
  0x55   : > { %194 = sbr.rel (%p1039_p6) target bundleno = 130 (0x82), region = 32  ;;  %s197_s9 = scalar_lea.sflag (!%p1039_p6), [#allocation3], %s196_s30 }
  0x56   : > { %s914_s21 = smul.u32 (!%p1039_p6), 80, %s198_s20  ;;  %p1040_p0 = scmp.ne.s32.totalorder (!%p1039_p6), %s1034_s28, 0 }
  0x58   : > { %s917_s11 = scalar_lea.vmem (!%p1039_p6), [#allocation2], %s914_s21 }
  0x5a   : > { %673 = dma.done.wait (%p1040_p0), %s197_s9, 1280  }
  0x5b   : > { %675 = vsyncadd (%p1040_p0), %s197_s9, 4294966016  ;;  %p1041_p11 = scmp.eq.s32.totalorder %s819_s25, 0 }
  0x5d   : > { %677 = dma.done.wait (%p1041_p11), [#allocation6], 80   ;;  %p1042_p3 = pmov %p1041_p11 }
  0x5e   : > { %s928_s4 = scalar_lea.vmem [#allocation7], %s914_s21 }
  0x5f   : > { %679 = vsyncadd (%p1042_p3), [#allocation6], 4294967216 }
  0x60   : > { %681 = dma.done.wait (%p1040_p0), %s197_s9, 1280  }
  0x61   : > { %683 = vsyncadd (%p1040_p0), %s197_s9, 4294966016  ;;  %v256_v0 = vlaneseq  ;;  %v244_v7 = vld [vmem:[%s917_s11] sm:$0xff]  ;;  %v245_v11 = vld [vmem:[%s917_s11 + $0x8] sm:$0xff]  ;;  %s952_s28 = scalar_lea.vmem [#allocation8], %s914_s21  ;;  %s481_s17 = smul.u32 1280, %s819_s25 }
  0x62   : > { %v254_v8 = vld [vmem:[#allocation5] sm:$0x1f]  ;;  %v291_v9 = vld [vmem:[%s928_s4] sm:$0xff]  ;;  %v293_v16 = vld [vmem:[%s928_s4 + $0x10] sm:$0xff]  ;;  %s356_s6 = sshll.u32 %s952_s28, 4  ;;  %s984_s10 = scalar_lea.sflag [#allocation4], %s198_s20  ;;  %s972_s6 = int_to_ptr.vmem [resolvable:$true] %s356_s6 }
  0x63   : > { %v257_v1 = vshrl.u32 %v256_v0, 7  ;;  %vm301_vm0 = vcmp.lt.u32.totalorder %v291_v9, 3006477107  ;;  %v292_v13 = vld [vmem:[%s928_s4 + $0x8] sm:$0xff]  ;;  %v247_v17 = vld [vmem:[%s917_s11 + $0x18] sm:$0xff]  ;;  %v248_v24 = vld [vmem:[%s917_s11 + $0x20] sm:$0xff]  ;;  %s977_s8 = scalar_lea.hbm %s1028_s3, %s481_s17 }
  0x64   : > { %v246_v14 = vld [vmem:[%s917_s11 + $0x10] sm:$0xff]  ;;  %vm302_vm1 = vcmp.lt.u32.totalorder %v292_v13, 3006477107  ;;  %v294_v19 = vld [vmem:[%s928_s4 + $0x18] sm:$0xff]  ;;  %vm303_vm2 = vcmp.lt.u32.totalorder %v293_v16, 3006477107 }
  0x65   : > { %v258_v2 = vsub.s32 0, %v257_v1  ;;  %v262_v3 = vsub.s32 1, %v257_v1  ;;  %v266_v4 = vsub.s32 2, %v257_v1  ;;  %v270_v5 = vsub.s32 3, %v257_v1  ;;  %v295_v25 = vld [vmem:[%s928_s4 + $0x20] sm:$0xff]  ;;  %v296_v29 = vld [vmem:[%s928_s4 + $0x28] sm:$0xff] }
  0x66   : > { %v274_v6 = vsub.s32 4, %v257_v1  ;;  %v249_v26 = vld [vmem:[%s917_s11 + $0x28] sm:$0xff]  ;;  %vm304_vm3 = vcmp.lt.u32.totalorder %v294_v19, 3006477107  ;;  %vm305_vm4 = vcmp.lt.u32.totalorder %v295_v25, 3006477107 }
  0x67   : > { %v259_v10 = vrot.slane %v254_v8, %v258_v2  ;;  %v263_v12 = vrot.slane %v254_v8, %v262_v3  ;;  %v267_v15 = vrot.slane %v254_v8, %v266_v4  ;;  %v271_v18 = vrot.slane %v254_v8, %v270_v5  ;;  %v250_v30 = vld [vmem:[%s917_s11 + $0x30] sm:$0xff]  ;;  %v251_v47 = vld [vmem:[%s917_s11 + $0x38] sm:$0xff]  ;;  %v252_v49 = vld [vmem:[%s917_s11 + $0x40] sm:$0xff]  ;;  %s630_s24 = scalar_lea.vmem %s972_s6, 1280  ;;  %p1043_p2 = scmp.ne.s32.totalorder %s1035_s27, 0 }
  0x68   : > { %v275_v20 = vrot.slane %v254_v8, %v274_v6  ;;  %vm306_vm5 = vcmp.lt.u32.totalorder %v296_v29, 3006477107  ;;  %v297_v42 = vld [vmem:[%s928_s4 + $0x30] sm:$0xff]  ;;  %v298_v48 = vld [vmem:[%s928_s4 + $0x38] sm:$0xff]  ;;  %v299_v53 = vld [vmem:[%s928_s4 + $0x40] sm:$0xff]  ;;  %p631_p12 = scmp.ne.s32.totalorder %s972_s6, %s630_s24  ;;  %s709_s26 = smov [#allocation8]  }
  0x69   : > { %v281_v21 = vadd.f32 %v259_v10, %v244_v7  ;;  %v282_v22 = vadd.f32 %v263_v12, %v245_v11  ;;  %v283_v23 = vadd.f32 %v267_v15, %v246_v14  ;;  %v284_v27 = vadd.f32 %v271_v18, %v247_v17  ;;  %v253_v54 = vld [vmem:[%s917_s11 + $0x48] sm:$0xff]  ;;  %s634_s18 = sshll.u32 %s709_s26, 4  ;;  %s635_s18 = int_to_ptr.vmem [resolvable:$false] %s634_s18 }
  0x6a   : > { %v285_v28 = vadd.f32 %v275_v20, %v248_v24  ;;  %v286_v34 = vadd.f32 %v259_v10, %v249_v26  ;;  %v287_v37 = vadd.f32 %v263_v12, %v250_v30  ;;  %vm307_vm6 = vcmp.lt.u32.totalorder %v297_v42, 3006477107  ;;  %v300_v55 = vld [vmem:[%s928_s4 + $0x48] sm:$0xff]  ;;  %p632_p8 = pnand %p631_p12, %p1043_p2  ;;  %s636_s22 = scalar_lea.vmem %s635_s18, 2560 }
  0x6b   : > { %v311_v31 = vmul.f32 1.4285715, %v281_v21  ;;  %v312_v32 = vmul.f32 1.4285715, %v282_v22  ;;  %v313_v33 = vmul.f32 1.4285715, %v283_v23  ;;  %v288_v51 = vadd.f32 %v267_v15, %v251_v47  ;;  %p637_p1 = scmp.lt.s32.totalorder %s972_s6, %s635_s18  ;;  %p638_p4 = scmp.lt.s32.totalorder %s636_s22, %s630_s24 }
  0x6c   : > { %v314_v35 = vmul.f32 1.4285715, %v284_v27  ;;  %v315_v36 = vmul.f32 1.4285715, %v285_v28  ;;  %v316_v41 = vmul.f32 1.4285715, %v286_v34  ;;  %v289_v52 = vadd.f32 %v271_v18, %v252_v49  ;;  %p633_p10 = pneg %p632_p8 }
  0x6d   : > { %v321_v38 = vsel %vm301_vm0, %v311_v31, 0.0  ;;  %v322_v39 = vsel %vm302_vm1, %v312_v32, 0.0  ;;  %v323_v40 = vsel %vm303_vm2, %v313_v33, 0.0  ;;  %v317_v45 = vmul.f32 1.4285715, %v287_v37  ;;  %p639_p5 = por %p638_p4, %p637_p1 }
  0x6e   : > { %331 = vst [vmem:[%s952_s28] sm:$0xff] %v321_v38  ;;  %332 = vst [vmem:[%s952_s28 + $0x8] sm:$0xff] %v322_v39  ;;  %v324_v43 = vsel %vm304_vm3, %v314_v35, 0.0  ;;  %v325_v44 = vsel %vm305_vm4, %v315_v36, 0.0  ;;  %v326_v46 = vsel %vm306_vm5, %v316_v41, 0.0  ;;  %vm308_vm7 = vcmp.lt.u32.totalorder %v298_v48, 3006477107 }
  0x6f   : > { %333 = vst [vmem:[%s952_s28 + $0x10] sm:$0xff] %v323_v40  ;;  %334 = vst [vmem:[%s952_s28 + $0x18] sm:$0xff] %v324_v43  ;;  %v327_v50 = vsel %vm307_vm6, %v317_v45, 0.0  ;;  %vm309_vm8 = vcmp.lt.u32.totalorder %v299_v53, 3006477107  ;;  %v290_v56 = vadd.f32 %v275_v20, %v253_v54  ;;  %p640_p9 = pnand %p639_p5, %p633_p10 }
  0x70   : > { %335 = vst [vmem:[%s952_s28 + $0x20] sm:$0xff] %v325_v44  ;;  %336 = vst [vmem:[%s952_s28 + $0x28] sm:$0xff] %v326_v46  ;;  %v318_v57 = vmul.f32 1.4285715, %v288_v51  ;;  %v319_v58 = vmul.f32 1.4285715, %v289_v52 }
  0x71   : > { %337 = vst [vmem:[%s952_s28 + $0x30] sm:$0xff] %v327_v50  ;;  %vm310_vm9 = vcmp.lt.u32.totalorder %v300_v55, 3006477107  ;;  %v320_v59 = vmul.f32 1.4285715, %v290_v56 }
  0x72   : > { %v328_v60 = vsel %vm308_vm7, %v318_v57, 0.0  ;;  %v329_v61 = vsel %vm309_vm8, %v319_v58, 0.0 }
  0x73   : > { %338 = vst [vmem:[%s952_s28 + $0x38] sm:$0xff] %v328_v60  ;;  %339 = vst [vmem:[%s952_s28 + $0x40] sm:$0xff] %v329_v61  ;;  %v330_v62 = vsel %vm310_vm9, %v320_v59, 0.0 }
  0x74   : > { %340 = vst [vmem:[%s952_s28 + $0x48] sm:$0xff] %v330_v62 }
  0x75   : > { %643 = shalt.err (!%p640_p9)
}
  0x76   : > { %s644_s23 = scalar_lea.hbm %s977_s8, 1280  ;;  %s648_s20 = scalar_lea.hbm %s1028_s3, 2560 }
  0x77   : > { %p645_p13 = scmp.ne.s32.totalorder %s977_s8, %s644_s23  ;;  %p649_p0 = scmp.lt.s32.totalorder %s977_s8, %s1028_s3 }
  0x78   : > { %p650_p11 = scmp.lt.s32.totalorder %s648_s20, %s644_s23 }
  0x79   : > { %p646_p7 = pnand %p645_p13, %p1043_p2 }
  0x7a   : > { %p651_p3 = por %p650_p11, %p649_p0 }
  0x7b   : > { %p647_p6 = pneg %p646_p7 }
  0x7d   : > { %p652_p12 = pnand %p651_p3, %p647_p6 }
  0x7f   : > { %655 = shalt.err (!%p652_p12)
}
  0x80   : > { %s710_s11 = smov 640   ;;  %s711_s4 = smov 40  }
  0x81   : > { %490 = dma.vmem_to_hbm [thread:$0]  (%p1043_p2), %s972_s6, 1280, %s977_s8, %s984_s10, %s710_s11, %s710_s11, %s711_s4  }
  0x82 PF: > { %s371_s28 = sand.u32 1, %s690_s12   ;;  %p1044_p8 = scmp.ne.s32.totalorder %s1036_s29, 0 }
  0x83   : > { %p1045_p10 = scmp.ge.s32.totalorder %s702_s15, 2  ;;  %s372_s17 = scalar_lea.sflag [#allocation4], %s371_s28 }
  0x85   : > { %p504_p1 = pnand %p1045_p10, %p1044_p8 }
  0x87   : > { %p505_p4 = pneg %p504_p1 }
  0x89   : > { %685 = dma.done.wait (%p505_p4), %s372_s17, 1280  }
  0x8a   : > { %687 = vsyncadd (%p505_p4), %s372_s17, 4294966016  ;;  %p17_p5 = scmp.ge.s32.totalorder %s753_s16, 4   ;;  %s1046_s12 = smov %s694_s13 }
  0x8b   : > { %s1047_s13 = smov %s698_s14  ;;  %s1048_s14 = smov %s764_s19 }
  0x8c   : > { %s1049_s15 = smov %s753_s16  ;;  %19 = sbr.rel (!%p17_p5) target bundleno = 6 (0x6), region = 92 }
  0x91   :  { %377 = vsyncpa [#allocation3], 1 }
  0x92   :  { %379 = vsyncpa [#allocation3 + $0x1], 1 }
  0x93   :  { %380 = vsyncpa [#allocation6], 1 }
  0x94   :  { %381 = vsyncpa [#allocation4], 1 }
  0x95   :  { %383 = vsyncpa [#allocation4 + $0x1], 1 }

</bundles_post_ra>
